<compile_context>
chip_gen: v7x
topology: tpu7x:2x2x1
jax: 0.10.0
libtpu: 0.0.40
codegen_flags: <defaults>
</compile_context>

<pallas_src>
import functools

import jax
import jax.numpy as jnp
from jax.experimental import pallas as pl
from jax.experimental.pallas import tpu as pltpu

_EPS = 1e-8          # matches torch.nn.functional.cosine_similarity default eps
_LANES = 128
_SUBLANES = 8


def _round_up(x, m):
    return ((x + m - 1) // m) * m


def _detect_vmem_and_cores():
    """Best-effort (per-core VMEM bytes, TensorCores per chip)."""
    vmem_phys = None
    num_tc = 1
    try:
        info = pltpu.get_tpu_info()
        v = getattr(info, "vmem_capacity_bytes", None)
        if v:
            vmem_phys = int(v)
        for attr in ("num_cores", "cores_per_chip", "num_tensorcores"):
            c = getattr(info, attr, None)
            if c:
                num_tc = max(num_tc, int(c))
                break
    except Exception:
        pass
    try:
        kind = jax.devices()[0].device_kind.lower()
        if "v7" in kind or "7x" in kind:
            num_tc = max(num_tc, 2)
            # v7x VMEM is 64 MiB per TensorCore; guard against per-chip reports.
            vmem_phys = min(vmem_phys or (64 * 1024 * 1024), 64 * 1024 * 1024)
    except Exception:
        pass
    if vmem_phys is None:
        # Unknown chip: assume the smallest per-core VMEM so the chosen
        # vmem_limit_bytes is always physically satisfiable.
        vmem_phys = 64 * 1024 * 1024
    return vmem_phys, num_tc


def _plan_tile_rows(m, d, in_itemsize, vmem_limit_bytes, tile_rows=None):
    """Largest row tile whose pipelined working set fits inside the VMEM limit."""
    if tile_rows is not None:
        tm = max(_SUBLANES, (int(tile_rows) // _SUBLANES) * _SUBLANES)
        return m if m <= tm else tm
    dpad = _round_up(max(d, 1), _LANES)              # lane padding of each row
    per_row_bytes = (
        4 * dpad * in_itemsize                       # 2 inputs x 2 pipeline buffers
        + 4 * dpad * 4                               # in-kernel f32 upcasts/products (peak live)
        + _LANES * 4                                 # (tm,1) f32 accumulator, lane-padded
    )
    budget = int(vmem_limit_bytes * 0.80)            # headroom for compiler scratch
    tm = budget // per_row_bytes
    tm = max(_SUBLANES, (int(tm) // _SUBLANES) * _SUBLANES)
    return m if m <= tm else tm


def _cos_partial_kernel(a_ref, b_ref, out_ref, acc_ref, *,
                        rows_per_tile, n_inner, n_rows, needs_mask):
    o = pl.program_id(0)   # outer (parallel) axis: one partial-sum tile per shard
    i = pl.program_id(1)   # inner (arbitrary) axis: walks row tiles

    @pl.when(i == 0)
    def _init():
        acc_ref[...] = jnp.zeros_like(acc_ref)

    a = a_ref[...].astype(jnp.float32)               # (tm, D)
    b = b_ref[...].astype(jnp.float32)               # (tm, D)

    dot = jnp.sum(a * b, axis=-1, keepdims=True)     # (tm, 1)
    na2 = jnp.sum(a * a, axis=-1, keepdims=True)
    nb2 = jnp.sum(b * b, axis=-1, keepdims=True)
    # torch: cos = dot / max(||a|| * ||b||, eps).  Multiply the norms (not the
    # squared norms) so large-magnitude rows cannot overflow float32.
    denom = jnp.maximum(jnp.sqrt(na2) * jnp.sqrt(nb2), jnp.float32(_EPS))
    cos = dot / denom

    if needs_mask:
        row0 = (o * n_inner + i) * rows_per_tile

        # Only tiles that can overrun the true row count pay for the iota mask.
        @pl.when(row0 + rows_per_tile > n_rows)
        def _acc_masked():
            row_ids = row0 + jax.lax.broadcasted_iota(
                jnp.int32, (rows_per_tile, 1), 0)
            # Mask BEFORE accumulating: padded / clamped-duplicate rows may hold
            # arbitrary data (select discards any NaN/Inf they produce).
            acc_ref[...] += jnp.where(row_ids < n_rows, cos, 0.0)

        @pl.when(row0 + rows_per_tile <= n_rows)
        def _acc_full():
            acc_ref[...] += cos
    else:
        acc_ref[...] += cos

    @pl.when(i == n_inner - 1)
    def _finalize():
        total = jnp.sum(acc_ref[...])                # one cross-lane reduce per shard
        r = jax.lax.broadcasted_iota(jnp.int32, (_SUBLANES, _LANES), 0)
        c = jax.lax.broadcasted_iota(jnp.int32, (_SUBLANES, _LANES), 1)
        out_ref[...] = jnp.where((r == 0) & (c == 0), total, 0.0)


def _cosine_partial_sums(a, b, *, tm, n_blocks, n_outer, n_inner, n_rows,
                         vmem_limit_bytes):
    d = a.shape[1]
    over_covered = (n_outer * n_inner != n_blocks)

    def in_index(o, i):
        lb = o * n_inner + i
        if over_covered:                 # grid over-covers rows: clamp DMA index
            lb = jnp.minimum(lb, n_blocks - 1)
        return (lb, 0)

    needs_mask = (n_outer * n_inner * tm != n_rows)

    kernel = functools.partial(
        _cos_partial_kernel, rows_per_tile=tm, n_inner=n_inner,
        n_rows=n_rows, needs_mask=needs_mask)

    return pl.pallas_call(
        kernel,
        out_shape=jax.ShapeDtypeStruct((n_outer * _SUBLANES, _LANES), jnp.float32),
        grid=(n_outer, n_inner),
        in_specs=[
            pl.BlockSpec((tm, d), in_index),
            pl.BlockSpec((tm, d), in_index),
        ],
        out_specs=pl.BlockSpec((_SUBLANES, _LANES), lambda o, i: (o, 0)),
        scratch_shapes=[pltpu.VMEM((tm, 1), jnp.float32)],
        compiler_params=pltpu.CompilerParams(
            dimension_semantics=("parallel", "arbitrary"),
            vmem_limit_bytes=int(vmem_limit_bytes),
        ),
    )(a, b)


def cosine_similarity_loss(inp, target, mask, *, tile_rows=None,
                           num_row_shards=None):
    """JAX/Pallas equivalent of CosineSimilarityLoss.forward(input, target, mask)."""
    # Glue: boolean-mask gather (data-dependent shape -> eager JAX, not in kernel).
    selected = inp[mask]                             # (M, D)
    m, d = selected.shape
    assert target.shape == (m, d), (target.shape, (m, d))
    if m == 0:
        # torch: mean over an empty selection is NaN.
        return jnp.float32(jnp.nan)

    vmem_phys, num_tc = _detect_vmem_and_cores()
    # ~78% of per-core physical VMEM: ~100 MiB on v5e/v6e (128 MiB), ~50 MiB on v7x.
    vmem_limit = min(int(vmem_phys * 0.78), 100 * 1024 * 1024)

    itemsize = max(jnp.dtype(selected.dtype).itemsize,
                   jnp.dtype(target.dtype).itemsize)
    tm = _plan_tile_rows(m, d, itemsize, vmem_limit, tile_rows)

    n_blocks = (m + tm - 1) // tm
    if num_row_shards is None:
        num_row_shards = num_tc                      # 1 on v5e/v6e, 2 on v7x
    n_outer = max(1, min(int(num_row_shards), n_blocks))
    n_inner = (n_blocks + n_outer - 1) // n_outer

    partials = _cosine_partial_sums(
        selected, target, tm=tm, n_blocks=n_blocks, n_outer=n_outer,
        n_inner=n_inner, n_rows=m, vmem_limit_bytes=vmem_limit)

    return jnp.float32(1.0) - jnp.sum(partials) / jnp.float32(m)


def _reference(inp, target, mask):
    sel = inp[mask].astype(jnp.float32)
    tgt = target.astype(jnp.float32)
    dot = jnp.sum(sel * tgt, axis=1)
    denom = jnp.maximum(
        jnp.linalg.norm(sel, axis=1) * jnp.linalg.norm(tgt, axis=1), _EPS)
    return 1.0 - jnp.mean(dot / denom)


if __name__ == "__main__":
    key = jax.random.PRNGKey(0)
    k1, k2, k3, k4, k5, k6 = jax.random.split(key, 6)

    # Check 1: small module-sized inputs (single tile, auto tiling), plus a
    # zero-norm target row to exercise the eps clamp (cos = 0 for that row).
    N1, D = 16, 32
    inp1 = jax.random.normal(k1, (N1, D), dtype=jnp.float32)
    mask1 = jax.random.bernoulli(k2, p=0.5, shape=(N1,))
    mask1 = mask1.at[0].set(True)                    # ensure at least one selected row
    m1 = int(mask1.sum())
    tgt1 = jax.random.normal(k3, (m1, D), dtype=jnp.float32)
    tgt1 = tgt1.at[0].set(0.0)

    loss1 = jax.block_until_ready(cosine_similarity_loss(inp1, tgt1, mask1))
    ref1 = _reference(inp1, tgt1, mask1)
    assert jnp.allclose(loss1, ref1, atol=1e-5, rtol=1e-5), (loss1, ref1)

    # Check 2: multi-tile path, single row shard, partial trailing tile.
    N2 = 64
    inp2 = jax.random.normal(k4, (N2, D), dtype=jnp.float32)
    mask2 = jax.random.bernoulli(k5, p=0.6, shape=(N2,))
    mask2 = mask2.at[:4].set(True)
    m2 = int(mask2.sum())
    tgt2 = jax.random.normal(k6, (m2, D), dtype=jnp.float32)

    loss2 = jax.block_until_ready(
        cosine_similarity_loss(inp2, tgt2, mask2, tile_rows=8, num_row_shards=1))
    ref2 = _reference(inp2, tgt2, mask2)
    assert jnp.allclose(loss2, ref2, atol=1e-5, rtol=1e-5), (loss2, ref2)

    # Check 3: 2-way sharded outer axis (v7x-style) with a coarser tile; may
    # exercise the clamped duplicate tile + fully-masked tile path.
    loss3 = jax.block_until_ready(
        cosine_similarity_loss(inp2, tgt2, mask2, tile_rows=16, num_row_shards=2))
    assert jnp.allclose(loss3, ref2, atol=1e-5, rtol=1e-5), (loss3, ref2)

    print("KERNEL_OK")
</pallas_src>

<mosaic_0001>
module attributes {stable_mosaic.version = 11 : i64} {
  func.func @_cos_partial_kernel(%arg0: i32, %arg1: i32, %arg2: memref<11x32xf32, #tpu.memory_space<vmem>>, %arg3: memref<11x32xf32, #tpu.memory_space<vmem>>, %arg4: memref<8x128xf32, #tpu.memory_space<vmem>>, %arg5: memref<11x1xf32, #tpu.memory_space<vmem>>) attributes {dimension_semantics = [#tpu.dimension_semantics<parallel>, #tpu.dimension_semantics<arbitrary>], iteration_bounds = array<i64: 1, 1>, scalar_prefetch = 0 : i64, scratch_operands = 1 : i64, tpu.core_type = #tpu.core_type<tc>, window_params = [{transform_indices = @transform_0, window_bounds = array<i64: 11, 32>}, {transform_indices = @transform_1, window_bounds = array<i64: 11, 32>}, {transform_indices = @transform_2, window_bounds = array<i64: 8, 128>}]} {
    %c0_i32 = arith.constant 0 : i32
    %0 = arith.cmpi eq, %arg1, %c0_i32 : i32
    %1 = arith.extui %0 : i1 to i32
    %c0_i32_0 = arith.constant 0 : i32
    %2 = arith.cmpi ne, %1, %c0_i32_0 : i32
    scf.if %2 {
      %cst_13 = arith.constant 0.000000e+00 : f32
      %26 = vector.broadcast %cst_13 : f32 to vector<11x1xf32>
      %c0_14 = arith.constant 0 : index
      %c0_15 = arith.constant 0 : index
      %27 = vector.load %arg5[%c0_14, %c0_15] : memref<11x1xf32, #tpu.memory_space<vmem>>, vector<11x1xf32>
      tpu.vector_store %arg5[%c0_14, %c0_15], %26 {strides = array<i32>} : memref<11x1xf32, #tpu.memory_space<vmem>>, vector<11x1xf32>,
    } else {
    }
    %c0 = arith.constant 0 : index
    %c0_1 = arith.constant 0 : index
    %3 = vector.load %arg2[%c0, %c0_1] : memref<11x32xf32, #tpu.memory_space<vmem>>, vector<11x32xf32>
    %c0_2 = arith.constant 0 : index
    %c0_3 = arith.constant 0 : index
    %4 = vector.load %arg3[%c0_2, %c0_3] : memref<11x32xf32, #tpu.memory_space<vmem>>, vector<11x32xf32>
    %5 = arith.mulf %3, %4 : vector<11x32xf32>
    %cst = arith.constant dense<0.000000e+00> : vector<11xf32>
    %6 = vector.multi_reduction <add>, %5, %cst [1] : vector<11x32xf32> to vector<11xf32>
    %7 = vector.shape_cast %6 : vector<11xf32> to vector<11x1xf32>
    %8 = arith.mulf %3, %3 : vector<11x32xf32>
    %cst_4 = arith.constant dense<0.000000e+00> : vector<11xf32>
    %9 = vector.multi_reduction <add>, %8, %cst_4 [1] : vector<11x32xf32> to vector<11xf32>
    %10 = vector.shape_cast %9 : vector<11xf32> to vector<11x1xf32>
    %11 = arith.mulf %4, %4 : vector<11x32xf32>
    %cst_5 = arith.constant dense<0.000000e+00> : vector<11xf32>
    %12 = vector.multi_reduction <add>, %11, %cst_5 [1] : vector<11x32xf32> to vector<11xf32>
    %13 = vector.shape_cast %12 : vector<11xf32> to vector<11x1xf32>
    %14 = math.sqrt %10 : vector<11x1xf32>
    %15 = math.sqrt %13 : vector<11x1xf32>
    %16 = arith.mulf %14, %15 : vector<11x1xf32>
    %cst_6 = arith.constant 9.99999993E-9 : f32
    %17 = vector.broadcast %cst_6 : f32 to vector<11x1xf32>
    %18 = arith.maximumf %16, %17 : vector<11x1xf32>
    %19 = arith.divf %7, %18 : vector<11x1xf32>
    %c0_7 = arith.constant 0 : index
    %c0_8 = arith.constant 0 : index
    %20 = vector.load %arg5[%c0_7, %c0_8] : memref<11x1xf32, #tpu.memory_space<vmem>>, vector<11x1xf32>
    %21 = arith.addf %20, %19 : vector<11x1xf32>
    %c0_9 = arith.constant 0 : index
    %c0_10 = arith.constant 0 : index
    %22 = vector.load %arg5[%c0_9, %c0_10] : memref<11x1xf32, #tpu.memory_space<vmem>>, vector<11x1xf32>
    tpu.vector_store %arg5[%c0_9, %c0_10], %21 {strides = array<i32>} : memref<11x1xf32, #tpu.memory_space<vmem>>, vector<11x1xf32>,
    %c0_i32_11 = arith.constant 0 : i32
    %23 = arith.cmpi eq, %arg1, %c0_i32_11 : i32
    %24 = arith.extui %23 : i1 to i32
    %c0_i32_12 = arith.constant 0 : i32
    %25 = arith.cmpi ne, %24, %c0_i32_12 : i32
    scf.if %25 {
      %c0_13 = arith.constant 0 : index
      %c0_14 = arith.constant 0 : index
      %26 = vector.load %arg5[%c0_13, %c0_14] : memref<11x1xf32, #tpu.memory_space<vmem>>, vector<11x1xf32>
      %27 = vector.shape_cast %26 : vector<11x1xf32> to vector<1x11x1xf32>
      %cst_15 = arith.constant dense<0.000000e+00> : vector<1xf32>
      %28 = vector.multi_reduction <add>, %27, %cst_15 [1, 2] : vector<1x11x1xf32> to vector<1xf32>
      %29 = vector.shape_cast %28 : vector<1xf32> to vector<1x1x1xf32>
      %30 = vector.extract %29[0, 0, 0] : f32 from vector<1x1x1xf32>
      %31 = tpu.iota {dimensions = array<i32: 0>} : vector<8x128xi32>
      %32 = tpu.iota {dimensions = array<i32: 1>} : vector<8x128xi32>
      %c0_i32_16 = arith.constant 0 : i32
      %33 = vector.broadcast %c0_i32_16 : i32 to vector<8x128xi32>
      %34 = arith.cmpi eq, %31, %33 : vector<8x128xi32>
      %c0_i32_17 = arith.constant 0 : i32
      %35 = vector.broadcast %c0_i32_17 : i32 to vector<8x128xi32>
      %36 = arith.cmpi eq, %32, %35 : vector<8x128xi32>
      %37 = arith.andi %34, %36 : vector<8x128xi1>
      %cst_18 = arith.constant 0.000000e+00 : f32
      %38 = vector.broadcast %30 : f32 to vector<8x128xf32>
      %39 = vector.broadcast %cst_18 : f32 to vector<8x128xf32>
      %40 = arith.select %37, %38, %39 : vector<8x128xi1>, vector<8x128xf32>
      %c0_19 = arith.constant 0 : index
      %c0_20 = arith.constant 0 : index
      %41 = vector.load %arg4[%c0_19, %c0_20] : memref<8x128xf32, #tpu.memory_space<vmem>>, vector<8x128xf32>
      tpu.vector_store %arg4[%c0_19, %c0_20], %40 {strides = array<i32>} : memref<8x128xf32, #tpu.memory_space<vmem>>, vector<8x128xf32>,
    } else {
    }
    return
  }
  func.func @transform_0(%arg0: i32, %arg1: i32) -> (i32, i32) {
    %c1_i32 = arith.constant 1 : i32
    %0 = arith.muli %arg0, %c1_i32 : i32
    %1 = arith.addi %0, %arg1 : i32
    %c0_i32 = arith.constant 0 : i32
    %c0_i32_0 = arith.constant 0 : i32
    return %1, %c0_i32 : i32, i32
  }
  func.func @transform_1(%arg0: i32, %arg1: i32) -> (i32, i32) {
    %c1_i32 = arith.constant 1 : i32
    %0 = arith.muli %arg0, %c1_i32 : i32
    %1 = arith.addi %0, %arg1 : i32
    %c0_i32 = arith.constant 0 : i32
    %c0_i32_0 = arith.constant 0 : i32
    return %1, %c0_i32 : i32, i32
  }
  func.func @transform_2(%arg0: i32, %arg1: i32) -> (i32, i32) {
    %c0_i32 = arith.constant 0 : i32
    %c0_i32_0 = arith.constant 0 : i32
    return %arg0, %c0_i32 : i32, i32
  }
}

</mosaic_0001>

<bundles_post_ra>
// kernel: tpu_custom_call.1
= control target key start
LH: loop header
LB: loop body
LE: loop exit
PB: predicated region body
PF: predicated region fallthrough
CT: control target
= control target key end

     0   :  { %7 = vsyncpa [#allocation4], 0  ;;  %s335_s0 = inlined_call_operand.hbm [shape: f32[11,32], index: 0, kind: input, shape index: {}]   ;;  %s336_s1 = inlined_call_operand.hbm [shape: f32[11,32], index: 1, kind: input, shape index: {}]   ;;  %s337_s2 = inlined_call_operand.hbm [shape: f32[8,128], index: 2, kind: output, shape index: {}]  }
   0x1   :  { %8 = vsyncpa [#allocation7], 0 }
   0x2   :  { %9 = vsyncpa [#allocation5], 0  ;;  %s269_s9 = smov [#allocation3]   ;;  %s197_s13 = scalar_lea.hbm %s335_s0, 256 }
   0x3   :  { %s19_s10 = sshll.u32 %s269_s9, 4  ;;  %p198_p0 = scmp.ne.s32.totalorder %s335_s0, %s197_s13  ;;  %s20_s10 = int_to_ptr.vmem [resolvable:$true] %s19_s10 }
   0x4   :  { %p201_p1 = scmp.lt.u32.totalorder %s197_s13, %s335_s0 }
   0x6   :  { %p203_p2 = pnand %p201_p1, %p198_p0 }
   0x8   :  { %206 = shalt.err (!%p203_p2)
}
   0x9   :  { %s207_s18 = scalar_lea.vmem %s20_s10, 256  ;;  %p212_p4 = scmp.lt.s32.totalorder %s20_s10, %s20_s10 }
   0xa   :  { %p208_p3 = scmp.ne.s32.totalorder %s20_s10, %s207_s18  ;;  %p213_p5 = scmp.lt.s32.totalorder %s207_s18, %s207_s18 }
   0xc   :  { %p214_p6 = por %p213_p5, %p212_p4 }
   0xe   :  { %p215_p7 = pnand %p214_p6, %p208_p3 }
  0x10   :  { %218 = shalt.err (!%p215_p7)
}
  0x11   :  { %s270_s19 = smov 128   ;;  %s271_s20 = smov 8  }
  0x12   :  { %25 = dma.hbm_to_vmem [thread:$0]  %s335_s0, 256, %s20_s10, [#allocation4], %s270_s19, %s270_s19, %s271_s20  }
  0x13   :  { %s272_s23 = smov [#allocation6]   ;;  %s219_s27 = scalar_lea.hbm %s336_s1, 256 }
  0x14   :  { %s35_s24 = sshll.u32 %s272_s23, 4  ;;  %p220_p8 = scmp.ne.s32.totalorder %s336_s1, %s219_s27  ;;  %s36_s24 = int_to_ptr.vmem [resolvable:$true] %s35_s24 }
  0x15   :  { %p223_p9 = scmp.lt.u32.totalorder %s219_s27, %s336_s1 }
  0x17   :  { %p225_p10 = pnand %p223_p9, %p220_p8 }
  0x19   :  { %228 = shalt.err (!%p225_p10)
}
  0x1a   :  { %s229_s4 = scalar_lea.vmem %s36_s24, 256  ;;  %p234_p12 = scmp.lt.s32.totalorder %s36_s24, %s36_s24 }
  0x1b   :  { %p230_p11 = scmp.ne.s32.totalorder %s36_s24, %s229_s4  ;;  %p235_p13 = scmp.lt.s32.totalorder %s229_s4, %s229_s4 }
  0x1d   :  { %p236_p0 = por %p235_p13, %p234_p12 }
  0x1f   :  { %p237_p1 = pnand %p236_p0, %p230_p11 }
  0x21   :  { %240 = shalt.err (!%p237_p1)
}
  0x22   :  { %41 = dma.hbm_to_vmem [thread:$0]  %s336_s1, 256, %s36_s24, [#allocation7], %s270_s19, %s270_s19, %s271_s20  }
  0x23   :  { %263 = dma.done.wait [#allocation4], 256  }
  0x24   :  { %264 = vsyncadd [#allocation4], 4294967040 }
  0x25   :  { %265 = dma.done.wait [#allocation7], 256  }
  0x26   :  { %266 = vsyncadd [#allocation7], 4294967040  ;;  %v62_v0 = vld [vmem:[#allocation6] sm:$0xff]  ;;  %vm66_vm0 = vcmask 261120   ;;  %v60_v1 = vld [vmem:[#allocation3] sm:$0xff]  ;;  %vm70_vm1 = vcmask 256000  }
  0x27   :  { %v63_v2 = vld [vmem:[#allocation6 + $0x8] sm:$0x7]  ;;  %v82_v3 = vmul.f32 %v62_v0, %v62_v0  ;;  %v74_v4 = vmul.f32 %v60_v1, %v60_v1  ;;  %v61_v6 = vld [vmem:[#allocation3 + $0x8] sm:$0x7]  ;;  %v64_v12 = vmul.f32 %v62_v0, %v60_v1  ;;  %vm56_vm2 = vcmask 7168   ;;  %s274_s1 = smov [#allocation8]  }
  0x28   :  { %v83_v5 = vmul.f32 %v63_v2, %v63_v2  ;;  %v75_v7 = vmul.f32 %v61_v6, %v61_v6  ;;  %v65_v13 = vmul.f32 %v63_v2, %v61_v6  ;;  %v273_v16 = vmov 0.0   ;;  %s167_s6 = sshll.u32 %s274_s1, 4  ;;  %s168_s6 = int_to_ptr.vmem [resolvable:$true] %s167_s6 }
  0x29   :  { %v84_v8 = vsel %vm66_vm0, %v82_v3, 0.0  ;;  %v76_v9 = vsel %vm66_vm0, %v74_v4, 0.0  ;;  %v67_v14 = vsel %vm66_vm0, %v64_v12, 0.0  ;;  %57 = vst.msk [vmem:[#allocation2] sm:$0xff] %vm56_vm2, %v273_v16  ;;  %vm58_vm3 = vcmask 2048   ;;  %s241_s8 = scalar_lea.vmem %s168_s6, 128  ;;  %p246_p3 = scmp.lt.s32.totalorder %s168_s6, %s168_s6 }
  0x2a   :  { %85 = vadd.xlane.f32.xlu1 %v84_v8  ;;  %77 = vadd.xlane.f32.xlu0 %v76_v9  ;;  %v87_v10 = vsel %vm70_vm1, %v83_v5, 0.0  ;;  %v79_v11 = vsel %vm70_vm1, %v75_v7, 0.0  ;;  %v71_v15 = vsel %vm70_vm1, %v65_v13, 0.0  ;;  %59 = vst.msk [vmem:[#allocation2 + $0x8] sm:$0x7] %vm58_vm3, %v273_v16  ;;  %v151_v3 = vlaneseq  ;;  %p242_p2 = scmp.ne.s32.totalorder %s168_s6, %s241_s8  ;;  %p247_p4 = scmp.lt.s32.totalorder %s241_s8, %s241_s8 }
  0x2c   :  { %v152_v4 = vshrl.u32 %v151_v3, 7  ;;  %v154_v5 = vand.u32 127, %v151_v3  ;;  %p248_p5 = por %p247_p4, %p246_p3 }
  0x2e   :  { %88 = vadd.xlane.f32.xlu1 %v87_v10  ;;  %80 = vadd.xlane.f32.xlu0 %v79_v11  ;;  %vm155_vm12 = vcmp.eq.s32.totalorder %v152_v4, 0  ;;  %vm156_vm13 = vcmp.eq.s32.totalorder %v154_v5, 0  ;;  %p249_p6 = pnand %p248_p5, %p242_p2 }
  0x2f   :  { %vm157_vm14 = vmand %vm155_vm12, %vm156_vm13 }
  0x30   :  { %v126_v47 = vld [vmem:[#allocation2] sm:$0xff] }
  0x31   :  { %v127_v52 = vld [vmem:[#allocation2 + $0x8] sm:$0x7] }
  0x32   :  { %68 = vadd.xlane.f32.xlu0 %v67_v14  ;;  %72 = vadd.xlane.f32.xlu1 %v71_v15 }
  0xb7   :  { %v86_v17 = vpop.xlane.xlu1 %85  ;;  %v78_v18 = vpop.xlane.xlu0 %77 }
  0xb8   :  { %185 = vrsqrt.f32 %v86_v17  ;;  %vm106_vm4 = vcmp.eq.f32.partialorder %v86_v17, inf  ;;  %v109_v24 = vand.u32 2147483648, %v86_v17  ;;  %vm108_vm5 = vcmp.eq.f32.partialorder %v86_v17, 0.0 }
  0xb9   :  { %187 = vrsqrt.f32 %v78_v18  ;;  %vm92_vm6 = vcmp.eq.f32.partialorder %v78_v18, inf  ;;  %v95_v27 = vand.u32 2147483648, %v78_v18  ;;  %vm94_vm7 = vcmp.eq.f32.partialorder %v78_v18, 0.0 }
  0xbb   :  { %v89_v19 = vpop.xlane.xlu1 %88  ;;  %v81_v20 = vpop.xlane.xlu0 %80 }
  0xbc   :  { %189 = vrsqrt.f32 %v89_v19  ;;  %vm113_vm8 = vcmp.eq.f32.partialorder %v89_v19, inf  ;;  %v116_v34 = vand.u32 2147483648, %v89_v19  ;;  %vm115_vm9 = vcmp.eq.f32.partialorder %v89_v19, 0.0 }
  0xbd   :  { %191 = vrsqrt.f32 %v81_v20  ;;  %vm99_vm10 = vcmp.eq.f32.partialorder %v81_v20, inf  ;;  %v102_v38 = vand.u32 2147483648, %v81_v20  ;;  %vm101_vm11 = vcmp.eq.f32.partialorder %v81_v20, 0.0 }
  0xbf   :  { %v69_v45 = vpop.xlane.xlu0 %68  ;;  %v73_v49 = vpop.xlane.xlu1 %72 }
  0xc2   :  { %v186_v21 = vpop.eup %185 }
  0xc3   :  { %v188_v22 = vpop.eup %187  ;;  %v105_v23 = vmul.f32 %v186_v21, %v86_v17 }
  0xc4   :  { %v91_v25 = vmul.f32 %v188_v22, %v78_v18 }
  0xc5   :  { %v107_v26 = vsel %vm106_vm4, %v86_v17, %v105_v23 }
  0xc6   :  { %v190_v28 = vpop.eup %189  ;;  %v93_v29 = vsel %vm92_vm6, %v78_v18, %v91_v25  ;;  %v110_v30 = vsel %vm108_vm5, %v109_v24, %v107_v26 }
  0xc7   :  { %v192_v31 = vpop.eup %191  ;;  %v112_v32 = vmul.f32 %v190_v28, %v89_v19  ;;  %v96_v33 = vsel %vm94_vm7, %v95_v27, %v93_v29 }
  0xc8   :  { %v98_v35 = vmul.f32 %v192_v31, %v81_v20  ;;  %v118_v36 = vmul.f32 %v110_v30, %v96_v33 }
  0xc9   :  { %v114_v37 = vsel %vm113_vm8, %v89_v19, %v112_v32 }
  0xca   :  { %v100_v39 = vsel %vm99_vm10, %v81_v20, %v98_v35  ;;  %v120_v40 = vmax.f32 %v118_v36, 1e-08  ;;  %v117_v41 = vsel %vm115_vm9, %v116_v34, %v114_v37 }
  0xcb   :  { %v103_v42 = vsel %vm101_vm11, %v102_v38, %v100_v39 }
  0xcc   :  { %193 = vrcp.f32 %v120_v40  ;;  %v119_v43 = vmul.f32 %v117_v41, %v103_v42 }
  0xce   :  { %v121_v44 = vmax.f32 %v119_v43, 1e-08 }
  0xd0   :  { %195 = vrcp.f32 %v121_v44 }
  0xd6   :  { %v194_v46 = vpop.eup %193 }
  0xd7   :  { %v123_v48 = vmul.f32 %v194_v46, %v69_v45 }
  0xd9   :  { %v128_v50 = vadd.f32 %v126_v47, %v123_v48 }
  0xda   :  { %v196_v51 = vpop.eup %195 }
  0xdb   :  { %131 = vst.msk [vmem:[#allocation2] sm:$0xff] %vm56_vm2, %v128_v50  ;;  %v125_v53 = vmul.f32 %v196_v51, %v73_v49 }
  0xdd   :  { %v129_v54 = vadd.f32 %v127_v52, %v125_v53 }
  0xdf   :  { %133 = vst.msk [vmem:[#allocation2 + $0x8] sm:$0x7] %vm58_vm3, %v129_v54 }
  0xe2   :  { %v137_v55 = vld [vmem:[#allocation2] sm:$0xff] }
  0xe3   :  { %v139_v57 = vsel %vm56_vm2, %v137_v55, 0.0 }
  0xe6   :  { %v138_v56 = vld [vmem:[#allocation2 + $0x8] sm:$0x7] }
  0xe7   :  { %v140_v58 = vsel %vm58_vm3, %v138_v56, 0.0 }
  0xe8   :  { %v141_v59 = vadd.f32 %v140_v58, %v139_v57 }
  0xea   :  { %142 = vadd.xlane.f32.xlu0 %v141_v59 }
 0x177   :  { %v143_v60 = vpop.xlane.xlu0 %142 }
 0x178   :  { %v144_v61 = vrot.slane %v143_v60, 4 }
 0x17a   :  { %v145_v62 = vadd.f32 %v144_v61, %v143_v60 }
 0x17c   :  { %v146_v63 = vrot.slane %v145_v62, 2 }
 0x17e   :  { %v147_v0 = vadd.f32 %v146_v63, %v145_v62 }
 0x180   :  { %v148_v1 = vrot.slane %v147_v0, 1 }
 0x182   :  { %v149_v2 = vadd.f32 %v148_v1, %v147_v0 }
 0x184   :  { %177 = vpush %v149_v2 }
 0x1b5   :  { %s178_s7 = spop %177 }
 0x1b6   :  { %v158_v6 = vstv %s178_s7 }
 0x1b7   :  { %v159_v7 = vsel %vm157_vm14, %v158_v6, 0.0 }
 0x1b8   :  { %160 = vst [vmem:[#allocation8] sm:$0xff] %v159_v7 }
 0x1b9   :  { %252 = shalt.err (!%p249_p6)
}
 0x1ba   :  { %s253_s11 = scalar_lea.hbm %s337_s2, 128 }
 0x1bb   :  { %p254_p7 = scmp.ne.s32.totalorder %s337_s2, %s253_s11  ;;  %p257_p8 = scmp.lt.u32.totalorder %s253_s11, %s337_s2 }
 0x1bd   :  { %p259_p9 = pnand %p257_p8, %p254_p7 }
 0x1bf   :  { %262 = shalt.err (!%p259_p9)
}
 0x1c0   :  { %170 = dma.vmem_to_hbm [thread:$0]  %s168_s6, 128, %s337_s2, [#allocation5]  }
 0x1c1   :  { %267 = dma.done.wait [#allocation5], 128  }
 0x1c2   :  { %268 = vsyncadd [#allocation5], 4294967168 }
 0x1c3   :  { %174 = vsyncpa [#allocation4], 1 }
 0x1c4   :  { %175 = vsyncpa [#allocation7], 1 }
 0x1c5   :  { %176 = vsyncpa [#allocation5], 1 }

</bundles_post_ra>
